<compile_context>
chip_gen: v5e
topology: v5e:2x2
jax: 0.10.0
libtpu: 0.0.40
codegen_flags: <defaults>
</compile_context>

<pallas_src>
import jax
import jax.numpy as jnp
from jax.experimental import pallas as pl
from jax.experimental.pallas import tpu as pltpu

_LANE = 128


def _round_up(v, m):
    return ((v + m - 1) // m) * m


def _softplus(x):
    # Numerically-stable softplus == torch.nn.functional.softplus (beta=1).
    return jnp.maximum(x, 0.0) + jnp.log1p(jnp.exp(-jnp.abs(x)))


def _make_kernel(in_dim, num_extra_layers, n_obs, n_rows, batch_pad, tile_rows,
                 compute_dtype):
    """Fused latent-encoder kernel over packed (B*N) observation rows."""
    inv_n = 1.0 / float(n_obs)

    def kernel(*refs):
        idx = 0
        xy_ref = refs[idx]; idx += 1          # (tile_rows, in_dim)   f32
        w0_ref = refs[idx]; idx += 1          # (in_dim, H0p)         f32
        b0_ref = refs[idx]; idx += 1          # (1, H0p)              f32
        extra = []
        for _ in range(num_extra_layers):     # (Hp, Hp) bf16, (1, Hp) f32
            extra.append((refs[idx], refs[idx + 1]))
            idx += 2
        w_lat_ref, b_lat_ref = refs[idx], refs[idx + 1]; idx += 2
        w_mu_ref, b_mu_ref = refs[idx], refs[idx + 1]; idx += 2
        w_sig_ref, b_sig_ref = refs[idx], refs[idx + 1]; idx += 2
        mu_ref, sigma_ref = refs[idx], refs[idx + 1]; idx += 2
        acc_ref = refs[idx]                   # (B_pad, Hlast_p) f32 scratch

        k = pl.program_id(0)
        nk = pl.num_programs(0)

        @pl.when(k == 0)
        def _():
            acc_ref[...] = jnp.zeros_like(acc_ref)

        # ---- first MLP layer: xy @ W0 + b0 (f32, VPU broadcast-MAC) -------
        # x_dim + y_dim is tiny for this 1-D regression task, so a couple of
        # broadcast multiply-adds beat a K=2 MXU matmul and keep layer 0 f32.
        # TODO(synk): for large x_dim+y_dim switch to a lane-padded MXU matmul.
        h = xy_ref[:, 0:1] * w0_ref[0:1, :] + b0_ref[...]
        for j in range(1, in_dim):
            h = h + xy_ref[:, j:j + 1] * w0_ref[j:j + 1, :]
        if num_extra_layers > 0:
            h = jnp.maximum(h, 0.0)

        # ---- remaining MLP layers: bf16 MXU matmuls, f32 accumulate -------
        for li, (w_ref, b_ref) in enumerate(extra):
            h = jnp.dot(h.astype(compute_dtype), w_ref[...],
                        preferred_element_type=jnp.float32) + b_ref[...]
            if li < num_extra_layers - 1:
                h = jnp.maximum(h, 0.0)

        # ---- per-batch segment sum for this row tile (one small matmul) ----
        # seg[b, r] = 1 iff global row (k*tile_rows + r) belongs to batch b and
        # is a real (non-padded) row.  Padded rows / batches fall out for free.
        col = (jax.lax.broadcasted_iota(jnp.int32, (batch_pad, tile_rows), 1)
               + k * tile_rows)
        bid = jax.lax.broadcasted_iota(jnp.int32, (batch_pad, tile_rows), 0)
        u = col - bid * n_obs
        valid = jnp.logical_and(jnp.logical_and(u >= 0, u < n_obs),
                                col < n_rows)
        seg = jnp.where(valid, 1.0, 0.0).astype(compute_dtype)   # exact 0/1
        acc_ref[...] += jnp.dot(seg, h.astype(compute_dtype),
                                preferred_element_type=jnp.float32)

        # ---- epilogue: batched heads (M = B_pad), runs once ----------------
        @pl.when(k == nk - 1)
        def _():
            hbar = acc_ref[...] * inv_n                     # (B_pad, Hlast_p)
            z = jnp.maximum(
                jnp.dot(hbar.astype(compute_dtype), w_lat_ref[...],
                        preferred_element_type=jnp.float32) + b_lat_ref[...],
                0.0)
            zc = z.astype(compute_dtype)
            mu_ref[...] = jnp.dot(zc, w_mu_ref[...],
                                  preferred_element_type=jnp.float32) + b_mu_ref[...]
            sig_raw = jnp.dot(zc, w_sig_ref[...],
                              preferred_element_type=jnp.float32) + b_sig_ref[...]
            sigma_ref[...] = _softplus(sig_raw)

    return kernel


def prepare_params(params, x_dim, y_dim, compute_dtype=jnp.bfloat16):
    """Pad / cast all weights ONCE (hoisted out of the per-forward hot path)."""
    mlp, (w_lat, b_lat), (w_mu, b_mu), (w_sig, b_sig) = params
    f32 = jnp.float32
    hidden = [w.shape[1] for w, _ in mlp]
    h_pad = [_round_up(h, _LANE) for h in hidden]
    mid_p = _round_up(w_lat.shape[1], _LANE)
    d = w_mu.shape[1]
    d_p = _round_up(d, _LANE)
    in_dim = x_dim + y_dim

    def pad2(w, rp, cp, dtype):
        return jnp.zeros((rp, cp), dtype).at[:w.shape[0], :w.shape[1]].set(
            w.astype(dtype))

    def pad_bias(b, cp):
        return jnp.zeros((1, cp), f32).at[0, :b.shape[0]].set(b.astype(f32))

    w0, b0 = mlp[0]
    arrays = {
        # Layer 0 stays f32: it is computed on the VPU.
        "w0": pad2(w0, in_dim, h_pad[0], f32),
        "b0": pad_bias(b0, h_pad[0]),
        "layers": [(pad2(mlp[i][0], h_pad[i - 1], h_pad[i], compute_dtype),
                    pad_bias(mlp[i][1], h_pad[i]))
                   for i in range(1, len(mlp))],
        "w_lat": pad2(w_lat, h_pad[-1], mid_p, compute_dtype),
        "b_lat": pad_bias(b_lat, mid_p),
        "w_mu": pad2(w_mu, mid_p, d_p, compute_dtype),
        "b_mu": pad_bias(b_mu, d_p),
        "w_sig": pad2(w_sig, mid_p, d_p, compute_dtype),
        "b_sig": pad_bias(b_sig, d_p),
    }
    meta = {"x_dim": x_dim, "y_dim": y_dim, "in_dim": in_dim,
            "hidden": tuple(hidden), "h_pad": tuple(h_pad),
            "mid_p": mid_p, "d": d, "d_p": d_p,
            "compute_dtype": compute_dtype}
    return arrays, meta


def latent_encoder_forward(x, y, prepared, *, max_tile_rows=1024,
                           row_align=256):
    """Pallas forward pass. Returns (mu, sigma) of the latent Normal."""
    arrays, meta = prepared
    f32 = jnp.float32
    B, N, x_dim = x.shape
    y_dim = y.shape[-1]
    assert x_dim == meta["x_dim"] and y_dim == meta["y_dim"]
    assert max_tile_rows % row_align == 0

    in_dim = meta["in_dim"]
    h_pad = meta["h_pad"]
    mid_p, d, d_p = meta["mid_p"], meta["d"], meta["d_p"]
    cdt = meta["compute_dtype"]
    num_extra = len(h_pad) - 1

    # Pack ALL (B*N) rows into the MXU M dimension; tile rows at a multiple of
    # 256 (MXU-native M on v6e/v7x, also a multiple of v5e's 128), capped at
    # max_tile_rows to amortize per-grid-step overhead.
    n_rows = B * N
    tile_rows = min(max_tile_rows, _round_up(n_rows, row_align))
    n_rows_pad = pl.cdiv(n_rows, tile_rows) * tile_rows
    B_pad = _round_up(B, 8)

    # Single packed (rows, x_dim+y_dim) input: one DMA stream per step.  Only
    # the (tiny-feature) packed copy is padded along rows; weights are prepared
    # once in prepare_params().
    xy = jnp.concatenate([x.astype(f32), y.astype(f32)],
                         axis=-1).reshape(n_rows, in_dim)
    if n_rows_pad != n_rows:
        xy = jnp.zeros((n_rows_pad, in_dim), f32).at[:n_rows].set(xy)

    const = lambda k: (0, 0)
    inputs = [xy, arrays["w0"], arrays["b0"]]
    in_specs = [
        pl.BlockSpec((tile_rows, in_dim), lambda k: (k, 0)),
        pl.BlockSpec(arrays["w0"].shape, const),
        pl.BlockSpec(arrays["b0"].shape, const),
    ]
    for wp, bp in arrays["layers"]:
        inputs += [wp, bp]
        in_specs += [pl.BlockSpec(wp.shape, const),
                     pl.BlockSpec(bp.shape, const)]
    for name in ("w_lat", "b_lat", "w_mu", "b_mu", "w_sig", "b_sig"):
        a = arrays[name]
        inputs.append(a)
        in_specs.append(pl.BlockSpec(a.shape, const))

    # Lane-dense (B_pad, d_p) outputs written once in the epilogue.
    out_shape = (jax.ShapeDtypeStruct((B_pad, d_p), f32),
                 jax.ShapeDtypeStruct((B_pad, d_p), f32))
    out_specs = (pl.BlockSpec((B_pad, d_p), const),
                 pl.BlockSpec((B_pad, d_p), const))

    # Advisory cost estimate for the XLA scheduler.
    dims_p = (in_dim,) + tuple(h_pad)
    flops = 2 * n_rows_pad * sum(dims_p[i] * dims_p[i + 1]
                                 for i in range(len(dims_p) - 1))
    flops += 2 * n_rows_pad * B_pad * h_pad[-1]              # segment sum
    flops += 2 * B_pad * (h_pad[-1] * mid_p + 2 * mid_p * d_p)  # heads
    bytes_accessed = (sum(int(a.size) * a.dtype.itemsize for a in inputs)
                      + 2 * B_pad * d_p * 4)

    kernel = _make_kernel(in_dim, num_extra, N, n_rows, B_pad, tile_rows, cdt)

    mu, sigma = pl.pallas_call(
        kernel,
        grid=(n_rows_pad // tile_rows,),
        in_specs=in_specs,
        out_specs=out_specs,
        out_shape=out_shape,
        scratch_shapes=[pltpu.VMEM((B_pad, h_pad[-1]), f32)],
        compiler_params=pltpu.CompilerParams(
            # Single reduction axis over row tiles; the scratch accumulator
            # requires it to stay sequential ("arbitrary").
            dimension_semantics=("arbitrary",),
            vmem_limit_bytes=32 * 1024 * 1024,
        ),
        cost_estimate=pl.CostEstimate(
            flops=int(flops),
            transcendentals=int(2 * B_pad * d_p),
            bytes_accessed=int(bytes_accessed),
        ),
    )(*inputs)

    # Slice away batch / feature padding before exposing results.
    return mu[:B, :d], sigma[:B, :d]


def init_params(key, x_dim, y_dim, out_dims, latent_dim):
    """Deterministic parameter init (PyTorch-style uniform fan-in bounds)."""
    def linear(k, din, dout):
        kw, kb = jax.random.split(k)
        bound = 1.0 / (din ** 0.5)
        w = jax.random.uniform(kw, (din, dout), jnp.float32, -bound, bound)
        b = jax.random.uniform(kb, (dout,), jnp.float32, -bound, bound)
        return w, b

    keys = jax.random.split(key, len(out_dims) + 3)
    mlp = []
    prev = x_dim + y_dim
    for i, h in enumerate(out_dims):
        mlp.append(linear(keys[i], prev, h))
        prev = h
    mid = (out_dims[-1] + latent_dim) // 2
    g_lat = linear(keys[len(out_dims)], out_dims[-1], mid)
    g_mu = linear(keys[len(out_dims) + 1], mid, latent_dim)
    g_sig = linear(keys[len(out_dims) + 2], mid, latent_dim)
    return mlp, g_lat, g_mu, g_sig


def _reference_forward(x, y, params, compute_dtype=jnp.bfloat16):
    """Pure-JAX reference. compute_dtype=None means full f32."""
    def cast(a):
        return a if compute_dtype is None else a.astype(compute_dtype)

    mlp, (w_lat, b_lat), (w_mu, b_mu), (w_sig, b_sig) = params
    B, N, _ = x.shape
    h = jnp.concatenate([x, y], axis=-1).reshape(B * N, -1).astype(jnp.float32)
    for i, (w, b) in enumerate(mlp):
        if i == 0:
            h = h @ w + b          # kernel keeps layer 0 in f32 (VPU path)
        else:
            h = jnp.dot(cast(h), cast(w),
                        preferred_element_type=jnp.float32) + b
        if i < len(mlp) - 1:
            h = jax.nn.relu(h)
    if compute_dtype is not None:
        # Mirrors the kernel's 0/1 bf16 segment matmul (f32 accumulation).
        h = h.astype(compute_dtype).astype(jnp.float32)
    h = h.reshape(B, N, -1).mean(axis=1)
    z = jax.nn.relu(jnp.dot(cast(h), cast(w_lat),
                            preferred_element_type=jnp.float32) + b_lat)
    mu = jnp.dot(cast(z), cast(w_mu),
                 preferred_element_type=jnp.float32) + b_mu
    sigma = jax.nn.softplus(jnp.dot(cast(z), cast(w_sig),
                                    preferred_element_type=jnp.float32) + b_sig)
    return mu, sigma


if __name__ == "__main__":
    # Small shapes consistent with the module's 1-D regression use-case.
    B, N = 2, 8
    x_dim, y_dim = 1, 1
    out_dims = (32, 32)
    latent_dim = 16

    key = jax.random.PRNGKey(0)
    kx, ky, kp = jax.random.split(key, 3)
    x = jax.random.normal(kx, (B, N, x_dim), dtype=jnp.float32)
    y = jax.random.normal(ky, (B, N, y_dim), dtype=jnp.float32)
    params = init_params(kp, x_dim, y_dim, out_dims, latent_dim)

    # Weight padding / casting hoisted out of the per-forward hot path.
    prepared = prepare_params(params, x_dim, y_dim)

    mu, sigma = latent_encoder_forward(x, y, prepared)
    jax.block_until_ready((mu, sigma))

    assert mu.shape == (B, latent_dim) and sigma.shape == (B, latent_dim)

    # Tight check vs a reference using the same bf16-matmul / f32-accum math.
    mu_ref, sigma_ref = _reference_forward(x, y, params, jnp.bfloat16)
    assert jnp.allclose(mu, mu_ref, atol=2e-3, rtol=2e-3)
    assert jnp.allclose(sigma, sigma_ref, atol=2e-3, rtol=2e-3)

    # Loose sanity check vs the full-precision reference semantics.
    mu_f32, sigma_f32 = _reference_forward(x, y, params, None)
    assert jnp.allclose(mu, mu_f32, atol=5e-2, rtol=5e-2)
    assert jnp.allclose(sigma, sigma_f32, atol=5e-2, rtol=5e-2)
    assert bool(jnp.all(sigma > 0.0))

    print("KERNEL_OK")
</pallas_src>

<mosaic_0001>
module attributes {stable_mosaic.version = 11 : i64} {
  func.func @kernel(%arg0: i32, %arg1: memref<256x2xf32, #tpu.memory_space<vmem>>, %arg2: memref<2x128xf32, #tpu.memory_space<vmem>>, %arg3: memref<1x128xf32, #tpu.memory_space<vmem>>, %arg4: memref<128x128xbf16, #tpu.memory_space<vmem>>, %arg5: memref<1x128xf32, #tpu.memory_space<vmem>>, %arg6: memref<128x128xbf16, #tpu.memory_space<vmem>>, %arg7: memref<1x128xf32, #tpu.memory_space<vmem>>, %arg8: memref<128x128xbf16, #tpu.memory_space<vmem>>, %arg9: memref<1x128xf32, #tpu.memory_space<vmem>>, %arg10: memref<128x128xbf16, #tpu.memory_space<vmem>>, %arg11: memref<1x128xf32, #tpu.memory_space<vmem>>, %arg12: memref<8x128xf32, #tpu.memory_space<vmem>>, %arg13: memref<8x128xf32, #tpu.memory_space<vmem>>, %arg14: memref<8x128xf32, #tpu.memory_space<vmem>>) attributes {dimension_semantics = [#tpu.dimension_semantics<arbitrary>], iteration_bounds = array<i64: 1>, scalar_prefetch = 0 : i64, scratch_operands = 1 : i64, tpu.core_type = #tpu.core_type<tc>, window_params = [{transform_indices = @transform_0, window_bounds = array<i64: 256, 2>}, {pipeline_mode = #tpu.pipeline_mode<synchronous>, transform_indices = @transform_1, window_bounds = array<i64: 2, 128>}, {pipeline_mode = #tpu.pipeline_mode<synchronous>, transform_indices = @transform_2, window_bounds = array<i64: 1, 128>}, {pipeline_mode = #tpu.pipeline_mode<synchronous>, transform_indices = @transform_3, window_bounds = array<i64: 128, 128>}, {pipeline_mode = #tpu.pipeline_mode<synchronous>, transform_indices = @transform_4, window_bounds = array<i64: 1, 128>}, {pipeline_mode = #tpu.pipeline_mode<synchronous>, transform_indices = @transform_5, window_bounds = array<i64: 128, 128>}, {pipeline_mode = #tpu.pipeline_mode<synchronous>, transform_indices = @transform_6, window_bounds = array<i64: 1, 128>}, {pipeline_mode = #tpu.pipeline_mode<synchronous>, transform_indices = @transform_7, window_bounds = array<i64: 128, 128>}, {pipeline_mode = #tpu.pipeline_mode<synchronous>, transform_indices = @transform_8, window_bounds = array<i64: 1, 128>}, {pipeline_mode = #tpu.pipeline_mode<synchronous>, transform_indices = @transform_9, window_bounds = array<i64: 128, 128>}, {pipeline_mode = #tpu.pipeline_mode<synchronous>, transform_indices = @transform_10, window_bounds = array<i64: 1, 128>}, {pipeline_mode = #tpu.pipeline_mode<synchronous>, transform_indices = @transform_11, window_bounds = array<i64: 8, 128>}, {pipeline_mode = #tpu.pipeline_mode<synchronous>, transform_indices = @transform_12, window_bounds = array<i64: 8, 128>}]} {
    %c0_i32 = arith.constant 0 : i32
    %0 = arith.cmpi eq, %arg0, %c0_i32 : i32
    %1 = arith.extui %0 : i1 to i32
    %c0_i32_0 = arith.constant 0 : i32
    %2 = arith.cmpi ne, %1, %c0_i32_0 : i32
    scf.if %2 {
      %cst_25 = arith.constant 0.000000e+00 : f32
      %53 = vector.broadcast %cst_25 : f32 to vector<8x128xf32>
      %c0_26 = arith.constant 0 : index
      %c0_27 = arith.constant 0 : index
      %54 = vector.load %arg14[%c0_26, %c0_27] : memref<8x128xf32, #tpu.memory_space<vmem>>, vector<8x128xf32>
      tpu.vector_store %arg14[%c0_26, %c0_27], %53 {strides = array<i32>} : memref<8x128xf32, #tpu.memory_space<vmem>>, vector<8x128xf32>,
    } else {
    }
    %c0 = arith.constant 0 : index
    %c0_1 = arith.constant 0 : index
    %3 = vector.load %arg1[%c0, %c0_1] : memref<256x2xf32, #tpu.memory_space<vmem>>, vector<256x1xf32>
    %c0_2 = arith.constant 0 : index
    %c0_3 = arith.constant 0 : index
    %4 = vector.load %arg2[%c0_2, %c0_3] : memref<2x128xf32, #tpu.memory_space<vmem>>, vector<1x128xf32>
    %5 = vector.broadcast %3 : vector<256x1xf32> to vector<256x128xf32>
    %6 = vector.broadcast %4 : vector<1x128xf32> to vector<256x128xf32>
    %7 = arith.mulf %5, %6 : vector<256x128xf32>
    %c0_4 = arith.constant 0 : index
    %c0_5 = arith.constant 0 : index
    %8 = vector.load %arg3[%c0_4, %c0_5] : memref<1x128xf32, #tpu.memory_space<vmem>>, vector<1x128xf32>
    %9 = vector.broadcast %8 : vector<1x128xf32> to vector<256x128xf32>
    %10 = arith.addf %7, %9 : vector<256x128xf32>
    %c0_6 = arith.constant 0 : index
    %c1 = arith.constant 1 : index
    %11 = vector.load %arg1[%c0_6, %c1] : memref<256x2xf32, #tpu.memory_space<vmem>>, vector<256x1xf32>
    %c1_7 = arith.constant 1 : index
    %c0_8 = arith.constant 0 : index
    %12 = vector.load %arg2[%c1_7, %c0_8] : memref<2x128xf32, #tpu.memory_space<vmem>>, vector<1x128xf32>
    %13 = vector.broadcast %11 : vector<256x1xf32> to vector<256x128xf32>
    %14 = vector.broadcast %12 : vector<1x128xf32> to vector<256x128xf32>
    %15 = arith.mulf %13, %14 : vector<256x128xf32>
    %16 = arith.addf %10, %15 : vector<256x128xf32>
    %cst = arith.constant 0.000000e+00 : f32
    %17 = vector.broadcast %cst : f32 to vector<256x128xf32>
    %18 = arith.maximumf %16, %17 : vector<256x128xf32>
    %19 = arith.truncf %18 : vector<256x128xf32> to vector<256x128xbf16>
    %c0_9 = arith.constant 0 : index
    %c0_10 = arith.constant 0 : index
    %20 = vector.load %arg4[%c0_9, %c0_10] : memref<128x128xbf16, #tpu.memory_space<vmem>>, vector<128x128xbf16>
    %cst_11 = arith.constant dense<0.000000e+00> : vector<256x128xf32>
    %21 = tpu.matmul %19, %20, %cst_11 {dimension_numbers = #tpu.dot_dimension_numbers<[1], [0], [0], [1], [0, 0, 1, 1], [], []>} : vector<256x128xbf16>, vector<128x128xbf16>, vector<256x128xf32> -> vector<256x128xf32>
    %c0_12 = arith.constant 0 : index
    %c0_13 = arith.constant 0 : index
    %22 = vector.load %arg5[%c0_12, %c0_13] : memref<1x128xf32, #tpu.memory_space<vmem>>, vector<1x128xf32>
    %23 = vector.broadcast %22 : vector<1x128xf32> to vector<256x128xf32>
    %24 = arith.addf %21, %23 : vector<256x128xf32>
    %25 = tpu.iota {dimensions = array<i32: 1>} : vector<8x256xi32>
    %c256_i32 = arith.constant 256 : i32
    %26 = arith.muli %arg0, %c256_i32 : i32
    %27 = vector.broadcast %26 : i32 to vector<8x256xi32>
    %28 = arith.addi %25, %27 : vector<8x256xi32>
    %29 = tpu.iota {dimensions = array<i32: 0>} : vector<8x256xi32>
    %c8_i32 = arith.constant 8 : i32
    %30 = vector.broadcast %c8_i32 : i32 to vector<8x256xi32>
    %31 = arith.muli %29, %30 : vector<8x256xi32>
    %32 = arith.subi %28, %31 : vector<8x256xi32>
    %c0_i32_14 = arith.constant 0 : i32
    %33 = vector.broadcast %c0_i32_14 : i32 to vector<8x256xi32>
    %34 = arith.cmpi sge, %32, %33 : vector<8x256xi32>
    %c8_i32_15 = arith.constant 8 : i32
    %35 = vector.broadcast %c8_i32_15 : i32 to vector<8x256xi32>
    %36 = arith.cmpi slt, %32, %35 : vector<8x256xi32>
    %37 = arith.andi %34, %36 : vector<8x256xi1>
    %c16_i32 = arith.constant 16 : i32
    %38 = vector.broadcast %c16_i32 : i32 to vector<8x256xi32>
    %39 = arith.cmpi slt, %28, %38 : vector<8x256xi32>
    %40 = arith.andi %37, %39 : vector<8x256xi1>
    %cst_16 = arith.constant 1.000000e+00 : f32
    %cst_17 = arith.constant 0.000000e+00 : f32
    %41 = vector.broadcast %cst_16 : f32 to vector<8x256xf32>
    %42 = vector.broadcast %cst_17 : f32 to vector<8x256xf32>
    %43 = arith.select %40, %41, %42 : vector<8x256xi1>, vector<8x256xf32>
    %44 = arith.truncf %43 : vector<8x256xf32> to vector<8x256xbf16>
    %c0_18 = arith.constant 0 : index
    %c0_19 = arith.constant 0 : index
    %45 = vector.load %arg14[%c0_18, %c0_19] : memref<8x128xf32, #tpu.memory_space<vmem>>, vector<8x128xf32>
    %46 = arith.truncf %24 : vector<256x128xf32> to vector<256x128xbf16>
    %cst_20 = arith.constant dense<0.000000e+00> : vector<8x128xf32>
    %47 = tpu.matmul %44, %46, %cst_20 {dimension_numbers = #tpu.dot_dimension_numbers<[1], [0], [0], [1], [0, 0, 1, 1], [], []>} : vector<8x256xbf16>, vector<256x128xbf16>, vector<8x128xf32> -> vector<8x128xf32>
    %48 = arith.addf %45, %47 : vector<8x128xf32>
    %c0_21 = arith.constant 0 : index
    %c0_22 = arith.constant 0 : index
    %49 = vector.load %arg14[%c0_21, %c0_22] : memref<8x128xf32, #tpu.memory_space<vmem>>, vector<8x128xf32>
    tpu.vector_store %arg14[%c0_21, %c0_22], %48 {strides = array<i32>} : memref<8x128xf32, #tpu.memory_space<vmem>>, vector<8x128xf32>,
    %c0_i32_23 = arith.constant 0 : i32
    %50 = arith.cmpi eq, %arg0, %c0_i32_23 : i32
    %51 = arith.extui %50 : i1 to i32
    %c0_i32_24 = arith.constant 0 : i32
    %52 = arith.cmpi ne, %51, %c0_i32_24 : i32
    scf.if %52 {
      %c0_25 = arith.constant 0 : index
      %c0_26 = arith.constant 0 : index
      %53 = vector.load %arg14[%c0_25, %c0_26] : memref<8x128xf32, #tpu.memory_space<vmem>>, vector<8x128xf32>
      %cst_27 = arith.constant 1.250000e-01 : f32
      %54 = vector.broadcast %cst_27 : f32 to vector<8x128xf32>
      %55 = arith.mulf %53, %54 : vector<8x128xf32>
      %56 = arith.truncf %55 : vector<8x128xf32> to vector<8x128xbf16>
      %c0_28 = arith.constant 0 : index
      %c0_29 = arith.constant 0 : index
      %57 = vector.load %arg6[%c0_28, %c0_29] : memref<128x128xbf16, #tpu.memory_space<vmem>>, vector<128x128xbf16>
      %cst_30 = arith.constant dense<0.000000e+00> : vector<8x128xf32>
      %58 = tpu.matmul %56, %57, %cst_30 {dimension_numbers = #tpu.dot_dimension_numbers<[1], [0], [0], [1], [0, 0, 1, 1], [], []>} : vector<8x128xbf16>, vector<128x128xbf16>, vector<8x128xf32> -> vector<8x128xf32>
      %c0_31 = arith.constant 0 : index
      %c0_32 = arith.constant 0 : index
      %59 = vector.load %arg7[%c0_31, %c0_32] : memref<1x128xf32, #tpu.memory_space<vmem>>, vector<1x128xf32>
      %60 = vector.broadcast %59 : vector<1x128xf32> to vector<8x128xf32>
      %61 = arith.addf %58, %60 : vector<8x128xf32>
      %cst_33 = arith.constant 0.000000e+00 : f32
      %62 = vector.broadcast %cst_33 : f32 to vector<8x128xf32>
      %63 = arith.maximumf %61, %62 : vector<8x128xf32>
      %64 = arith.truncf %63 : vector<8x128xf32> to vector<8x128xbf16>
      %c0_34 = arith.constant 0 : index
      %c0_35 = arith.constant 0 : index
      %65 = vector.load %arg8[%c0_34, %c0_35] : memref<128x128xbf16, #tpu.memory_space<vmem>>, vector<128x128xbf16>
      %cst_36 = arith.constant dense<0.000000e+00> : vector<8x128xf32>
      %66 = tpu.matmul %64, %65, %cst_36 {dimension_numbers = #tpu.dot_dimension_numbers<[1], [0], [0], [1], [0, 0, 1, 1], [], []>} : vector<8x128xbf16>, vector<128x128xbf16>, vector<8x128xf32> -> vector<8x128xf32>
      %c0_37 = arith.constant 0 : index
      %c0_38 = arith.constant 0 : index
      %67 = vector.load %arg9[%c0_37, %c0_38] : memref<1x128xf32, #tpu.memory_space<vmem>>, vector<1x128xf32>
      %68 = vector.broadcast %67 : vector<1x128xf32> to vector<8x128xf32>
      %69 = arith.addf %66, %68 : vector<8x128xf32>
      %c0_39 = arith.constant 0 : index
      %c0_40 = arith.constant 0 : index
      %70 = vector.load %arg12[%c0_39, %c0_40] : memref<8x128xf32, #tpu.memory_space<vmem>>, vector<8x128xf32>
      tpu.vector_store %arg12[%c0_39, %c0_40], %69 {strides = array<i32>} : memref<8x128xf32, #tpu.memory_space<vmem>>, vector<8x128xf32>,
      %c0_41 = arith.constant 0 : index
      %c0_42 = arith.constant 0 : index
      %71 = vector.load %arg10[%c0_41, %c0_42] : memref<128x128xbf16, #tpu.memory_space<vmem>>, vector<128x128xbf16>
      %cst_43 = arith.constant dense<0.000000e+00> : vector<8x128xf32>
      %72 = tpu.matmul %64, %71, %cst_43 {dimension_numbers = #tpu.dot_dimension_numbers<[1], [0], [0], [1], [0, 0, 1, 1], [], []>} : vector<8x128xbf16>, vector<128x128xbf16>, vector<8x128xf32> -> vector<8x128xf32>
      %c0_44 = arith.constant 0 : index
      %c0_45 = arith.constant 0 : index
      %73 = vector.load %arg11[%c0_44, %c0_45] : memref<1x128xf32, #tpu.memory_space<vmem>>, vector<1x128xf32>
      %74 = vector.broadcast %73 : vector<1x128xf32> to vector<8x128xf32>
      %75 = arith.addf %72, %74 : vector<8x128xf32>
      %cst_46 = arith.constant 0.000000e+00 : f32
      %76 = vector.broadcast %cst_46 : f32 to vector<8x128xf32>
      %77 = arith.maximumf %75, %76 : vector<8x128xf32>
      %78 = math.absf %75 : vector<8x128xf32>
      %cst_47 = arith.constant 0.000000e+00 : f32
      %79 = vector.broadcast %cst_47 : f32 to vector<8x128xf32>
      %80 = arith.subf %79, %78 : vector<8x128xf32>
      %81 = math.exp %80 : vector<8x128xf32>
      %82 = math.log1p %81 : vector<8x128xf32>
      %83 = arith.addf %77, %82 : vector<8x128xf32>
      %c0_48 = arith.constant 0 : index
      %c0_49 = arith.constant 0 : index
      %84 = vector.load %arg13[%c0_48, %c0_49] : memref<8x128xf32, #tpu.memory_space<vmem>>, vector<8x128xf32>
      tpu.vector_store %arg13[%c0_48, %c0_49], %83 {strides = array<i32>} : memref<8x128xf32, #tpu.memory_space<vmem>>, vector<8x128xf32>,
    } else {
    }
    return
  }
  func.func @transform_0(%arg0: i32) -> (i32, i32) {
    %c0_i32 = arith.constant 0 : i32
    %c0_i32_0 = arith.constant 0 : i32
    return %arg0, %c0_i32 : i32, i32
  }
  func.func @transform_1(%arg0: i32) -> (i32, i32) {
    %c0_i32 = arith.constant 0 : i32
    %c0_i32_0 = arith.constant 0 : i32
    %c0_i32_1 = arith.constant 0 : i32
    return %c0_i32, %c0_i32_0 : i32, i32
  }
  func.func @transform_2(%arg0: i32) -> (i32, i32) {
    %c0_i32 = arith.constant 0 : i32
    %c0_i32_0 = arith.constant 0 : i32
    %c0_i32_1 = arith.constant 0 : i32
    return %c0_i32, %c0_i32_0 : i32, i32
  }
  func.func @transform_3(%arg0: i32) -> (i32, i32) {
    %c0_i32 = arith.constant 0 : i32
    %c0_i32_0 = arith.constant 0 : i32
    %c0_i32_1 = arith.constant 0 : i32
    return %c0_i32, %c0_i32_0 : i32, i32
  }
  func.func @transform_4(%arg0: i32) -> (i32, i32) {
    %c0_i32 = arith.constant 0 : i32
    %c0_i32_0 = arith.constant 0 : i32
    %c0_i32_1 = arith.constant 0 : i32
    return %c0_i32, %c0_i32_0 : i32, i32
  }
  func.func @transform_5(%arg0: i32) -> (i32, i32) {
    %c0_i32 = arith.constant 0 : i32
    %c0_i32_0 = arith.constant 0 : i32
    %c0_i32_1 = arith.constant 0 : i32
    return %c0_i32, %c0_i32_0 : i32, i32
  }
  func.func @transform_6(%arg0: i32) -> (i32, i32) {
    %c0_i32 = arith.constant 0 : i32
    %c0_i32_0 = arith.constant 0 : i32
    %c0_i32_1 = arith.constant 0 : i32
    return %c0_i32, %c0_i32_0 : i32, i32
  }
  func.func @transform_7(%arg0: i32) -> (i32, i32) {
    %c0_i32 = arith.constant 0 : i32
    %c0_i32_0 = arith.constant 0 : i32
    %c0_i32_1 = arith.constant 0 : i32
    return %c0_i32, %c0_i32_0 : i32, i32
  }
  func.func @transform_8(%arg0: i32) -> (i32, i32) {
    %c0_i32 = arith.constant 0 : i32
    %c0_i32_0 = arith.constant 0 : i32
    %c0_i32_1 = arith.constant 0 : i32
    return %c0_i32, %c0_i32_0 : i32, i32
  }
  func.func @transform_9(%arg0: i32) -> (i32, i32) {
    %c0_i32 = arith.constant 0 : i32
    %c0_i32_0 = arith.constant 0 : i32
    %c0_i32_1 = arith.constant 0 : i32
    return %c0_i32, %c0_i32_0 : i32, i32
  }
  func.func @transform_10(%arg0: i32) -> (i32, i32) {
    %c0_i32 = arith.constant 0 : i32
    %c0_i32_0 = arith.constant 0 : i32
    %c0_i32_1 = arith.constant 0 : i32
    return %c0_i32, %c0_i32_0 : i32, i32
  }
  func.func @transform_11(%arg0: i32) -> (i32, i32) {
    %c0_i32 = arith.constant 0 : i32
    %c0_i32_0 = arith.constant 0 : i32
    %c0_i32_1 = arith.constant 0 : i32
    return %c0_i32, %c0_i32_0 : i32, i32
  }
  func.func @transform_12(%arg0: i32) -> (i32, i32) {
    %c0_i32 = arith.constant 0 : i32
    %c0_i32_0 = arith.constant 0 : i32
    %c0_i32_1 = arith.constant 0 : i32
    return %c0_i32, %c0_i32_0 : i32, i32
  }
}

</mosaic_0001>

<bundles_post_ra>
// kernel: tpu_custom_call.1
= control target key start
LH: loop header
LB: loop body
LE: loop exit
PB: predicated region body
PF: predicated region fallthrough
CT: control target
= control target key end

     0   :  { %18 = vsyncpa [#allocation4], 0  ;;  %v1369_v2 = vmov 1   ;;  %v1370_v3 = vmov 0   ;;  %s1901_s0 = inlined_call_operand.vmem [shape: f32[256,2], index: 0, kind: input, shape index: {}]   ;;  %s1902_s1 = inlined_call_operand.vmem [shape: f32[2,128], index: 1, kind: input, shape index: {}]   ;;  %s1903_s2 = inlined_call_operand.vmem [shape: f32[1,128], index: 2, kind: input, shape index: {}]   ;;  %s1904_s3 = inlined_call_operand.vmem [shape: bf16[128,128], index: 3, kind: input, shape index: {}]   ;;  %s1905_s4 = inlined_call_operand.vmem [shape: f32[1,128], index: 4, kind: input, shape index: {}]   ;;  %s1906_s5 = inlined_call_operand.vmem [shape: bf16[128,128], index: 5, kind: input, shape index: {}]   ;;  %s1907_s6 = inlined_call_operand.vmem [shape: f32[1,128], index: 6, kind: input, shape index: {}]   ;;  %s1908_s7 = inlined_call_operand.vmem [shape: bf16[128,128], index: 7, kind: input, shape index: {}]   ;;  %s1909_s8 = inlined_call_operand.vmem [shape: f32[1,128], index: 8, kind: input, shape index: {}]   ;;  %s1910_s9 = inlined_call_operand.vmem [shape: bf16[128,128], index: 9, kind: input, shape index: {}]   ;;  %s1911_s10 = inlined_call_operand.vmem [shape: f32[1,128], index: 10, kind: input, shape index: {}]   ;;  %s1912_s11 = inlined_call_operand.hbm [shape: f32[8,128], index: 11, kind: output, shape index: {0}]   ;;  %s1913_s12 = inlined_call_operand.hbm [shape: f32[8,128], index: 12, kind: output, shape index: {1}]  }
   0x1   :  { %v69_v0 = vld [vmem:[%s1901_s0 + $0xb0] sm:$0xff]  ;;  %v47_v1 = vld [vmem:[%s1901_s0] sm:$0xff]  ;;  %1272 = vset.pattern.permute.xlu1 %v1369_v2  ;;  %1273 = vset.pattern.permute.xlu2 %v1370_v3 }
   0x2   :  { %1271 = vset.pattern.permute.xlu0 %v1370_v3  ;;  %399 = vperm.xlu1 %1272, %v69_v0  }
   0x3   :  { %192 = vperm.xlu0 %1271, %v69_v0   ;;  %82 = vperm.xlu2 %1273, %v47_v1  }
   0x4   :  { %19 = vsyncpa [#allocation6], 0  ;;  %v70_v4 = vld [vmem:[%s1901_s0 + $0xb8] sm:$0xff]  ;;  %v48_v5 = vld [vmem:[%s1901_s0 + $0x8] sm:$0xff]  ;;  %s1054_s19 = sshll.u32 %s1912_s11, 4  ;;  %s1065_s20 = sshll.u32 %s1913_s12, 4  ;;  %s1055_s19 = int_to_ptr.hbm [resolvable:$true] %s1054_s19  ;;  %s1066_s20 = int_to_ptr.hbm [resolvable:$true] %s1065_s20 }
   0x5   :  { %v71_v6 = vld [vmem:[%s1901_s0 + $0xc0] sm:$0xff]  ;;  %v72_v7 = vld [vmem:[%s1901_s0 + $0xc8] sm:$0xff]  ;;  %v49_v8 = vld [vmem:[%s1901_s0 + $0x10] sm:$0xff] }
   0x6   :  { %v50_v9 = vld [vmem:[%s1901_s0 + $0x18] sm:$0xff]  ;;  %v51_v10 = vld [vmem:[%s1901_s0 + $0x20] sm:$0xff]  ;;  %v73_v11 = vld [vmem:[%s1901_s0 + $0xd0] sm:$0xff] }
   0x7   :  { %v76_v12 = vld [vmem:[%s1901_s0 + $0xe8] sm:$0xff]  ;;  %v74_v13 = vld [vmem:[%s1901_s0 + $0xd8] sm:$0xff]  ;;  %v1496_v16 = vld [vmem:[%s1901_s0 + $0x40] sm:$0xff] }
   0x8   :  { %v64_v14 = vld [vmem:[%s1901_s0 + $0x88] sm:$0xff]  ;;  %v75_v17 = vld [vmem:[%s1901_s0 + $0xe0] sm:$0xff]  ;;  %v1216_v18 = vld [vmem:[%s1904_s3 + $0x38] sm:$0xff] }
   0x9   :  { %v52_v15 = vld [vmem:[%s1901_s0 + $0x28] sm:$0xff]  ;;  %1243 = vmatpush.bf16.msra.mxu3 %v1216_v18  ;;  %619 = vmatpush.bf16.msra.mxu0 %v1216_v18  ;;  %v1215_v19 = vld [vmem:[%s1904_s3 + $0x30] sm:$0xff]  ;;  %v63_v21 = vld [vmem:[%s1901_s0 + $0x80] sm:$0xff] }
   0xa   :  { %403 = vperm.xlu1 %1272, %v70_v4   ;;  %1242 = vmatpush.bf16.msra.mxu2 %v1216_v18  ;;  %v1214_v20 = vld [vmem:[%s1904_s3 + $0x28] sm:$0xff]  ;;  %v1213_v22 = vld [vmem:[%s1904_s3 + $0x20] sm:$0xff]  ;;  %v53_v23 = vld [vmem:[%s1901_s0 + $0x30] sm:$0xff] }
   0xb   :  { %197 = vperm.xlu0 %1271, %v70_v4   ;;  %87 = vperm.xlu2 %1273, %v48_v5   ;;  %v54_v24 = vld [vmem:[%s1901_s0 + $0x38] sm:$0xff]  ;;  %v1534_v26 = vld [vmem:[%s1901_s0 + $0xf0] sm:$0xff]  ;;  %v1210_v29 = vld [vmem:[%s1904_s3 + $0x8] sm:$0xff] }
   0xc   :  { %1241 = vmatpush.bf16.msra.mxu1 %v1216_v18  ;;  %v1212_v25 = vld [vmem:[%s1904_s3 + $0x18] sm:$0xff]  ;;  %v1211_v27 = vld [vmem:[%s1904_s3 + $0x10] sm:$0xff]  ;;  %v1547_v30 = vld [vmem:[%s1901_s0 + $0x48] sm:$0xff] }
   0xd   :  { %1246 = vmatpush.bf16.msra.mxu3 %v1215_v19  ;;  %620 = vmatpush.bf16.msra.mxu0 %v1215_v19  ;;  %v1209_v31 = vld [vmem:[%s1904_s3] sm:$0xff]  ;;  %v1557_v33 = vld [vmem:[%s1901_s0 + $0x78] sm:$0xff]  ;;  %v60_v36 = vld [vmem:[%s1901_s0 + $0x68] sm:$0xff] }
   0xe   :  { %1245 = vmatpush.bf16.msra.mxu2 %v1215_v19  ;;  %v59_v35 = vld [vmem:[%s1901_s0 + $0x60] sm:$0xff]  ;;  %v78_v53 = vld [vmem:[%s1901_s0 + $0xf8] sm:$0xff] }
   0xf   :  { %v1571_v37 = vld [vmem:[%s1901_s0 + $0xa0] sm:$0xff] }
  0x10   :  { %1244 = vmatpush.bf16.msra.mxu1 %v1215_v19  ;;  %v1576_v38 = vld [vmem:[%s1902_s1] ss:$0 sm:$0xff]  ;;  %v1589_v44 = vld [vmem:[%s1902_s1 + $0x1] ss:$0 sm:$0xff] }
  0x11   :  { %1249 = vmatpush.bf16.msra.mxu3 %v1214_v20  ;;  %621 = vmatpush.bf16.msra.mxu0 %v1214_v20  ;;  %v1582_v42 = vld [vmem:[%s1903_s2] ss:$0 sm:$0xff] }
  0x12   :  { %315 = vperm.xlu1 %1272, %v48_v5   ;;  %1248 = vmatpush.bf16.msra.mxu2 %v1214_v20 }
  0x13   :  { %1274 = vset.pattern.permute.xlu0 %v1369_v2  ;;  %202 = vperm.xlu2 %1273, %v71_v6  }
  0x14   :  { %311 = vperm.xlu0 %1274, %v47_v1   ;;  %1247 = vmatpush.bf16.msra.mxu1 %v1214_v20 }
  0x15   :  { %1252 = vmatpush.bf16.msra.mxu3 %v1213_v22  ;;  %622 = vmatpush.bf16.msra.mxu0 %v1213_v22 }
  0x16   :  { %1251 = vmatpush.bf16.msra.mxu2 %v1213_v22 }
  0x18   :  { %1250 = vmatpush.bf16.msra.mxu1 %v1213_v22 }
  0x19   :  { %1255 = vmatpush.bf16.msra.mxu3 %v1212_v25  ;;  %623 = vmatpush.bf16.msra.mxu0 %v1212_v25 }
  0x1a   :  { %1275 = vset.pattern.permute.xlu1 %v1370_v3  ;;  %1254 = vmatpush.bf16.msra.mxu2 %v1212_v25 }
  0x1b   :  { %1276 = vset.pattern.permute.xlu2 %v1369_v2  ;;  %207 = vperm.xlu1 %1275, %v72_v7  }
  0x1c   :  { %411 = vperm.xlu0 %1274, %v72_v7   ;;  %407 = vperm.xlu2 %1276, %v71_v6  }
  0x1d   :  { %1258 = vmatpush.bf16.msra.mxu3 %v1211_v27  ;;  %624 = vmatpush.bf16.msra.mxu0 %v1211_v27 }
  0x1e   :  { %1253 = vmatpush.bf16.msra.mxu1 %v1212_v25  ;;  %1257 = vmatpush.bf16.msra.mxu2 %v1211_v27 }
  0x21   :  { %1261 = vmatpush.bf16.msra.mxu3 %v1210_v29  ;;  %625 = vmatpush.bf16.msra.mxu0 %v1210_v29 }
  0x22   :  { %1256 = vmatpush.bf16.msra.mxu1 %v1211_v27  ;;  %1260 = vmatpush.bf16.msra.mxu2 %v1210_v29 }
  0x23   :  { %92 = vperm.xlu1 %1275, %v49_v8  }
  0x24   :  { %319 = vperm.xlu0 %1274, %v49_v8   ;;  %1277 = vset.pattern.permute.xlu2 %v1370_v3 }
  0x25   :  { %97 = vperm.xlu2 %1277, %v50_v9   ;;  %1264 = vmatpush.bf16.msra.mxu3 %v1209_v31 }
  0x26   :  { %626 = vmatpush.bf16.msra.mxu0 %v1209_v31  ;;  %1259 = vmatpush.bf16.msra.mxu1 %v1210_v29 }
  0x27   :  { %1263 = vmatpush.bf16.msra.mxu2 %v1209_v31 }
  0x2a   :  { %1262 = vmatpush.bf16.msra.mxu1 %v1209_v31 }
  0x2b   :  { %1278 = vset.pattern.permute.xlu1 %v1369_v2 }
  0x2c   :  { %327 = vperm.xlu0 %1274, %v51_v10   ;;  %323 = vperm.xlu1 %1278, %v50_v9  }
  0x2d   :  { %212 = vperm.xlu2 %1277, %v73_v11  }
  0x34   :  { %427 = vperm.xlu0 %1274, %v76_v12   ;;  %415 = vperm.xlu1 %1278, %v73_v11  }
  0x35   :  { %1279 = vset.pattern.permute.xlu2 %v1369_v2 }
  0x36   :  { %419 = vperm.xlu2 %1279, %v74_v13  }
  0x3c   :  { %379 = vperm.xlu0 %1274, %v64_v14   ;;  %1280 = vset.pattern.permute.xlu1 %v1370_v3 }
  0x3d   :  { %102 = vperm.xlu1 %1280, %v51_v10  }
  0x3e   :  { %1281 = vset.pattern.permute.xlu2 %v1370_v3 }
  0x3f   :  { %107 = vperm.xlu2 %1281, %v52_v15  }
  0x44   :  { %343 = vperm.xlu0 %1274, %v1496_v16  }
  0x45   :  { %1282 = vset.pattern.permute.xlu1 %v1369_v2 }
  0x46   :  { %331 = vperm.xlu1 %1282, %v52_v15  }
  0x47   :  { %222 = vperm.xlu2 %1281, %v75_v17  }
  0x4c   :  { %1296 = vset.pattern.permute.xlu0 %v1370_v3 }
  0x4d   :  { %217 = vperm.xlu0 %1296, %v74_v13  }
  0x4e   :  { %1283 = vset.pattern.permute.xlu1 %v1370_v3 }
  0x4f   :  { %1284 = vset.pattern.permute.xlu2 %v1369_v2  ;;  %227 = vperm.xlu1 %1283, %v76_v12  }
  0x50   :  { %423 = vperm.xlu2 %1284, %v75_v17  }
  0x55   :  { %162 = vperm.xlu0 %1296, %v63_v21  }
  0x57   :  { %112 = vperm.xlu1 %1283, %v53_v23  }
  0x58   :  { %1285 = vset.pattern.permute.xlu2 %v1370_v3 }
  0x59   :  { %117 = vperm.xlu2 %1285, %v54_v24  }
  0x5d   :  { %v83_v28 = vpop.permute.xlu2 %82  ;;  %232 = vperm.xlu0 %1296, %v1534_v26  }
  0x5e   :  { %v241_v57 = vmul.f32 %v1576_v38, %v83_v28 }
  0x5f   :  { %167 = vperm.xlu1 %1283, %v64_v14  }
  0x60   :  { %v277_v1 = vadd.f32 %v1582_v42, %v241_v57 }
  0x61   :  { %1286 = vset.pattern.permute.xlu2 %v1369_v2 }
  0x62   :  { %335 = vperm.xlu2 %1286, %v53_v23   ;;  %v66_v23 = vld [vmem:[%s1901_s0 + $0x98] sm:$0xff] }
  0x65   :  { %v88_v32 = vpop.permute.xlu2 %87  ;;  %127 = vperm.xlu0 %1296, %v1547_v30  }
  0x66   :  { %v242_v55 = vmul.f32 %v1576_v38, %v88_v32  ;;  %v58_v32 = vld [vmem:[%s1901_s0 + $0x58] sm:$0xff] }
  0x67   :  { %1287 = vset.pattern.permute.xlu1 %v1369_v2 }
  0x68   :  { %339 = vperm.xlu1 %1287, %v54_v24   ;;  %v278_v61 = vadd.f32 %v1582_v42, %v242_v55 }
  0x6a   :  { %375 = vperm.xlu2 %1286, %v63_v21  }
  0x6d   :  { %v203_v34 = vpop.permute.xlu2 %202  ;;  %157 = vperm.xlu0 %1296, %v1557_v33  }
  0x6e   :  { %v265_v7 = vmul.f32 %v1576_v38, %v203_v34 }
  0x70   :  { %1288 = vset.pattern.permute.xlu1 %v1370_v3  ;;  %v301_v11 = vadd.f32 %v1582_v42, %v265_v7  ;;  %v68_v7 = vld [vmem:[%s1901_s0 + $0xa8] sm:$0xff] }
  0x71   :  { %142 = vperm.xlu1 %1288, %v59_v35  }
  0x72   :  { %1289 = vset.pattern.permute.xlu2 %v1370_v3 }
  0x73   :  { %147 = vperm.xlu2 %1289, %v60_v36  }
  0x74   :  { %v400_v39 = vpop.permute.xlu1 %399 }
  0x75   :  { %v193_v40 = vpop.permute.xlu0 %192  ;;  %182 = vperm.xlu0 %1296, %v1571_v37   ;;  %v461_v48 = vmul.f32 %v1589_v44, %v400_v39 }
  0x76   :  { %v408_v41 = vpop.permute.xlu2 %407  ;;  %v263_v43 = vmul.f32 %v1576_v38, %v193_v40 }
  0x77   :  { %v463_v12 = vmul.f32 %v1589_v44, %v408_v41 }
  0x78   :  { %v299_v45 = vadd.f32 %v1582_v42, %v263_v43 }
  0x79   :  { %1290 = vset.pattern.permute.xlu1 %v1369_v2  ;;  %v495_v19 = vadd.f32 %v463_v12, %v301_v11 }
  0x7a   :  { %359 = vperm.xlu1 %1290, %v59_v35   ;;  %v493_v54 = vadd.f32 %v461_v48, %v299_v45 }
  0x7b   :  { %1291 = vset.pattern.permute.xlu2 %v1369_v2  ;;  %v527_v24 = vmax.f32 %v495_v19, 0.0 }
  0x7c   :  { %363 = vperm.xlu2 %1291, %v60_v36   ;;  %v404_v46 = vpop.permute.xlu1 %403  ;;  %v525_v59 = vmax.f32 %v493_v54, 0.0 }
  0x7d   :  { %v198_v47 = vpop.permute.xlu0 %197  ;;  %1304 = vset.pattern.permute.xlu0 %v1369_v2  ;;  %v462_v51 = vmul.f32 %v1589_v44, %v404_v46 }
  0x7e   :  { %v264_v49 = vmul.f32 %v1576_v38, %v198_v47  ;;  %355 = vperm.xlu0 %1304, %v58_v32  }
  0x7f   :  { %v98_v50 = vpop.permute.xlu2 %97 }
  0x80   :  { %v300_v52 = vadd.f32 %v1582_v42, %v264_v49  ;;  %v244_v34 = vmul.f32 %v1576_v38, %v98_v50  ;;  %v61_v50 = vld [vmem:[%s1901_s0 + $0x70] sm:$0xff] }
  0x82   :  { %1292 = vset.pattern.permute.xlu1 %v1370_v3  ;;  %v494_v56 = vadd.f32 %v462_v51, %v300_v52  ;;  %v280_v41 = vadd.f32 %v1582_v42, %v244_v34 }
  0x83   :  { %237 = vperm.xlu1 %1292, %v78_v53  }
  0x84   :  { %431 = vperm.xlu2 %1291, %v1534_v26   ;;  %v316_v58 = vpop.permute.xlu1 %315  ;;  %v526_v60 = vmax.f32 %v494_v56, 0.0 }
  0x85   :  { %v440_v62 = vmul.f32 %v1589_v44, %v316_v58  ;;  %v57_v58 = vld [vmem:[%s1901_s0 + $0x50] sm:$0xff] }
  0x86   :  { %v312_v63 = vpop.permute.xlu0 %311  ;;  %v546_v0 = vpack.c.bf16 %v526_v60, %v525_v59 }
  0x87   :  { %v472_v4 = vadd.f32 %v440_v62, %v278_v61  ;;  %v439_v5 = vmul.f32 %v1589_v44, %v312_v63  ;;  %v1609_v6 = vpop.permute.xlu2 %212 }
  0x88   :  { %682 = vmatmul.bf16.vlgmr.msra.gmra.mxu3 %v546_v0 }
  0x89   :  { %v504_v8 = vmax.f32 %v472_v4, 0.0  ;;  %v471_v9 = vadd.f32 %v439_v5, %v277_v1  ;;  %v267_v5 = vmul.f32 %v1576_v38, %v1609_v6 }
  0x8b   :  { %v503_v10 = vmax.f32 %v471_v9, 0.0  ;;  %1293 = vset.pattern.permute.xlu1 %v1369_v2 }
  0x8c   :  { %1294 = vset.pattern.permute.xlu2 %v1370_v3  ;;  %435 = vperm.xlu1 %1293, %v78_v53  }
  0x8d   :  { %122 = vperm.xlu2 %1294, %v1496_v16   ;;  %v208_v13 = vpop.permute.xlu1 %207  ;;  %v535_v14 = vpack.c.bf16 %v504_v8, %v503_v10  ;;  %v65_v16 = vld [vmem:[%s1901_s0 + $0x90] sm:$0xff] }
  0x8e   :  { %v266_v15 = vmul.f32 %v1576_v38, %v208_v13  ;;  %v412_v17 = vpop.permute.xlu0 %411  ;;  %v303_v13 = vadd.f32 %v1582_v42, %v267_v5 }
  0x8f   :  { %v464_v18 = vmul.f32 %v1589_v44, %v412_v17  ;;  %627 = vmatmul.bf16.vlgmr.msra.gmra.mxu0 %v535_v14 }
  0x90   :  { %v302_v20 = vadd.f32 %v1582_v42, %v266_v15  ;;  %v1620_v21 = vpop.permute.xlu2 %419 }
  0x91   :  { %v466_v6 = vmul.f32 %v1589_v44, %v1620_v21 }
  0x92   :  { %v496_v22 = vadd.f32 %v464_v18, %v302_v20 }
  0x94   :  { %v528_v25 = vmax.f32 %v496_v22, 0.0  ;;  %1295 = vset.pattern.permute.xlu1 %v1370_v3 }
  0x95   :  { %177 = vperm.xlu2 %1294, %v66_v23   ;;  %172 = vperm.xlu1 %1295, %v65_v16   ;;  %v93_v26 = vpop.permute.xlu1 %92 }
  0x96   :  { %v320_v27 = vpop.permute.xlu0 %319  ;;  %v547_v28 = vpack.c.bf16 %v528_v25, %v527_v24  ;;  %v243_v29 = vmul.f32 %v1576_v38, %v93_v26 }
  0x97   :  { %v441_v36 = vmul.f32 %v1589_v44, %v320_v27 }
  0x98   :  { %687 = vmatmul.bf16.gmra.mxu3 %v547_v28  ;;  %v279_v35 = vadd.f32 %v1582_v42, %v243_v29 }
  0x99   :  { %v108_v31 = vpop.permute.xlu2 %107 }
  0x9a   :  { %v473_v43 = vadd.f32 %v441_v36, %v279_v35  ;;  %v246_v60 = vmul.f32 %v1576_v38, %v108_v31 }
  0x9c   :  { %v505_v48 = vmax.f32 %v473_v43, 0.0  ;;  %v282_v63 = vadd.f32 %v1582_v42, %v246_v60 }
  0x9d   :  { %1298 = vset.pattern.permute.xlu2 %v1369_v2  ;;  %1297 = vset.pattern.permute.xlu1 %v1369_v2 }
  0x9e   :  { %383 = vperm.xlu2 %1298, %v65_v16   ;;  %347 = vperm.xlu1 %1297, %v1547_v30   ;;  %v324_v39 = vpop.permute.xlu1 %323  ;;  %v328_v40 = vpop.permute.xlu0 %327 }
  0x9f   :  { %v442_v45 = vmul.f32 %v1589_v44, %v324_v39  ;;  %v443_v59 = vmul.f32 %v1589_v44, %v328_v40 }
  0xa1   :  { %v474_v46 = vadd.f32 %v442_v45, %v280_v41  ;;  %v223_v47 = vpop.permute.xlu2 %222 }
  0xa2   :  { %v269_v27 = vmul.f32 %v1576_v38, %v223_v47 }
  0xa3   :  { %v506_v49 = vmax.f32 %v474_v46, 0.0 }
  0xa4   :  { %v305_v31 = vadd.f32 %v1582_v42, %v269_v27 }
  0xa5   :  { %v536_v51 = vpack.c.bf16 %v506_v49, %v505_v48 }
  0xa6   :  { %1299 = vset.pattern.permute.xlu2 %v1370_v3  ;;  %387 = vperm.xlu1 %1297, %v66_v23   ;;  %v416_v30 = vpop.permute.xlu1 %415  ;;  %v428_v52 = vpop.permute.xlu0 %427 }
  0xa7   :  { %152 = vperm.xlu2 %1299, %v61_v50   ;;  %632 = vmatmul.bf16.gmra.mxu0 %v536_v51  ;;  %v465_v11 = vmul.f32 %v1589_v44, %v416_v30  ;;  %v468_v28 = vmul.f32 %v1589_v44, %v428_v52 }
  0xa9   :  { %v497_v17 = vadd.f32 %v465_v11, %v303_v13 }
  0xaa   :  { %v424_v53 = vpop.permute.xlu2 %423 }
  0xab   :  { %v529_v20 = vmax.f32 %v497_v17, 0.0 }
  0xae   :  { %367 = vperm.xlu1 %1297, %v61_v50   ;;  %v1645_v54 = vpop.permute.xlu0 %379 }
  0xaf   :  { %1300 = vset.pattern.permute.xlu2 %v1369_v2  ;;  %v103_v55 = vpop.permute.xlu1 %102  ;;  %v456_v45 = vmul.f32 %v1589_v44, %v1645_v54 }
  0xb0   :  { %371 = vperm.xlu2 %1300, %v1557_v33   ;;  %v245_v56 = vmul.f32 %v1576_v38, %v103_v55 }
  0xb2   :  { %v281_v61 = vadd.f32 %v1582_v42, %v245_v56 }
  0xb3   :  { %v1650_v57 = vpop.permute.xlu2 %117 }
  0xb4   :  { %v475_v1 = vadd.f32 %v443_v59, %v281_v61  ;;  %v248_v51 = vmul.f32 %v1576_v38, %v1650_v57 }
  0xb6   :  { %1301 = vset.pattern.permute.xlu1 %v1370_v3  ;;  %v1659_v62 = vpop.permute.xlu0 %343  ;;  %v507_v10 = vmax.f32 %v475_v1, 0.0  ;;  %v284_v54 = vadd.f32 %v1582_v42, %v248_v51 }
  0xb7   :  { %132 = vperm.xlu1 %1301, %v57_v58  }
  0xb8   :  { %v332_v33 = vpop.permute.xlu1 %331  ;;  %1302 = vset.pattern.permute.xlu2 %v1370_v3 }
  0xb9   :  { %v444_v0 = vmul.f32 %v1589_v44, %v332_v33  ;;  %137 = vperm.xlu2 %1302, %v58_v32  }
  0xbb   :  { %v476_v4 = vadd.f32 %v444_v0, %v282_v63 }
  0xbc   :  { %v336_v9 = vpop.permute.xlu2 %335 }
  0xbd   :  { %v508_v8 = vmax.f32 %v476_v4, 0.0  ;;  %v445_v30 = vmul.f32 %v1589_v44, %v336_v9 }
  0xbf   :  { %v218_v3 = vpop.permute.xlu0 %217  ;;  %187 = vperm.xlu1 %1301, %v68_v7   ;;  %v537_v12 = vpack.c.bf16 %v508_v8, %v507_v10 }
  0xc0   :  { %v268_v14 = vmul.f32 %v1576_v38, %v218_v3 }
  0xc1   :  { %v228_v15 = vpop.permute.xlu1 %227  ;;  %637 = vmatmul.bf16.gmra.mxu0 %v537_v12  ;;  %1303 = vset.pattern.permute.xlu2 %v1369_v2 }
  0xc2   :  { %v304_v18 = vadd.f32 %v1582_v42, %v268_v14  ;;  %351 = vperm.xlu2 %1303, %v57_v58   ;;  %v270_v24 = vmul.f32 %v1576_v38, %v228_v15 }
  0xc4   :  { %v498_v19 = vadd.f32 %v466_v6, %v304_v18  ;;  %v376_v23 = vpop.permute.xlu2 %375  ;;  %v306_v29 = vadd.f32 %v1582_v42, %v270_v24 }
  0xc5   :  { %v455_v32 = vmul.f32 %v1589_v44, %v376_v23 }
  0xc6   :  { %v530_v22 = vmax.f32 %v498_v19, 0.0  ;;  %v500_v34 = vadd.f32 %v468_v28, %v306_v29 }
  0xc7   :  { %1305 = vset.pattern.permute.xlu1 %v1369_v2  ;;  %v163_v16 = vpop.permute.xlu0 %162  ;;  %v467_v2 = vmul.f32 %v1589_v44, %v424_v53 }
  0xc8   :  { %391 = vperm.xlu1 %1305, %v1571_v37   ;;  %v548_v25 = vpack.c.bf16 %v530_v22, %v529_v20  ;;  %v257_v21 = vmul.f32 %v1576_v38, %v163_v16  ;;  %v532_v47 = vmax.f32 %v500_v34, 0.0 }
  0xc9   :  { %v113_v26 = vpop.permute.xlu1 %112  ;;  %v499_v39 = vadd.f32 %v467_v2, %v305_v31 }
  0xca   :  { %692 = vmatmul.bf16.gmra.mxu3 %v548_v25  ;;  %395 = vperm.xlu2 %1303, %v68_v7   ;;  %v293_v37 = vadd.f32 %v1582_v42, %v257_v21  ;;  %v247_v43 = vmul.f32 %v1576_v38, %v113_v26 }
  0xcb   :  { %v531_v48 = vmax.f32 %v499_v39, 0.0 }
  0xcc   :  { %v487_v41 = vadd.f32 %v455_v32, %v293_v37  ;;  %v283_v52 = vadd.f32 %v1582_v42, %v247_v43  ;;  %v447_v43 = vmul.f32 %v1589_v44, %v1659_v62 }
  0xcd   :  { %v148_v35 = vpop.permute.xlu2 %147  ;;  %v549_v53 = vpack.c.bf16 %v532_v47, %v531_v48  ;;  %v1718_v47 = vld [vmem:[%s1905_s4] ss:$0 sm:$0xff] }
  0xce   :  { %v519_v50 = vmax.f32 %v487_v41, 0.0  ;;  %v477_v61 = vadd.f32 %v445_v30, %v283_v52  ;;  %v254_v4 = vmul.f32 %v1576_v38, %v148_v35 }
  0xcf   :  { %v233_v18 = vpop.permute.xlu0 %232 }
  0xd0   :  { %v509_v0 = vmax.f32 %v477_v61, 0.0  ;;  %v290_v7 = vadd.f32 %v1582_v42, %v254_v4  ;;  %v271_v20 = vmul.f32 %v1576_v38, %v233_v18 }
  0xd1   :  { %v168_v36 = vpop.permute.xlu1 %167 }
  0xd2   :  { %v258_v40 = vmul.f32 %v1576_v38, %v168_v36  ;;  %v307_v16 = vadd.f32 %v1582_v42, %v271_v20 }
  0xd4   :  { %v294_v46 = vadd.f32 %v1582_v42, %v258_v40 }
  0xd6   :  { %v488_v49 = vadd.f32 %v456_v45, %v294_v46  ;;  %v364_v59 = vpop.permute.xlu2 %363 }
  0xd7   :  { %v452_v8 = vmul.f32 %v1589_v44, %v364_v59  ;;  %v128_v34 = vpop.permute.xlu0 %127 }
  0xd8   :  { %v520_v55 = vmax.f32 %v488_v49, 0.0  ;;  %v250_v45 = vmul.f32 %v1576_v38, %v128_v34 }
  0xd9   :  { %v484_v11 = vadd.f32 %v452_v8, %v290_v7 }
  0xda   :  { %697 = vmatmul.bf16.gmra.mxu3 %v549_v53  ;;  %v340_v56 = vpop.permute.xlu1 %339  ;;  %v543_v58 = vpack.c.bf16 %v520_v55, %v519_v50  ;;  %v286_v49 = vadd.f32 %v1582_v42, %v250_v45 }
  0xdb   :  { %v446_v60 = vmul.f32 %v1589_v44, %v340_v56  ;;  %v516_v15 = vmax.f32 %v484_v11, 0.0 }
  0xdc   :  { %667 = vmatmul.bf16.vlgmr.msra.gmra.mxu2 %v543_v58 }
  0xdd   :  { %v478_v33 = vadd.f32 %v446_v60, %v284_v54 }
  0xde   :  { %v432_v5 = vpop.permute.xlu2 %431 }
  0xdf   :  { %v510_v63 = vmax.f32 %v478_v33, 0.0  ;;  %v469_v23 = vmul.f32 %v1589_v44, %v432_v5  ;;  %v158_v50 = vpop.permute.xlu0 %157 }
  0xe1   :  { %v538_v57 = vpack.c.bf16 %v510_v63, %v509_v0  ;;  %v501_v21 = vadd.f32 %v469_v23, %v307_v16 }
  0xe3   :  { %v143_v1 = vpop.permute.xlu1 %142  ;;  %642 = vmatmul.bf16.gmra.mxu0 %v538_v57  ;;  %v533_v2 = vmax.f32 %v501_v21, 0.0 }
  0xe4   :  { %v253_v9 = vmul.f32 %v1576_v38, %v143_v1 }
  0xe6   :  { %v289_v3 = vadd.f32 %v1582_v42, %v253_v9 }
  0xe7   :  { %v123_v13 = vpop.permute.xlu2 %122  ;;  %v183_v11 = vpop.permute.xlu0 %182 }
  0xe8   :  { %v249_v37 = vmul.f32 %v1576_v38, %v123_v13 }
  0xea   :  { %v285_v36 = vadd.f32 %v1582_v42, %v249_v37 }
  0xec   :  { %v360_v10 = vpop.permute.xlu1 %359  ;;  %v479_v46 = vadd.f32 %v447_v43, %v285_v36 }
  0xed   :  { %v451_v12 = vmul.f32 %v1589_v44, %v360_v10  ;;  %v256_v10 = vmul.f32 %v1576_v38, %v158_v50 }
  0xee   :  { %v511_v55 = vmax.f32 %v479_v46, 0.0 }
  0xef   :  { %v483_v14 = vadd.f32 %v451_v12, %v289_v3  ;;  %v178_v22 = vpop.permute.xlu2 %177 }
  0xf0   :  { %v260_v62 = vmul.f32 %v1576_v38, %v178_v22 }
  0xf1   :  { %v515_v6 = vmax.f32 %v483_v14, 0.0 }
  0xf2   :  { %v296_v7 = vadd.f32 %v1582_v42, %v260_v62 }
  0xf3   :  { %v541_v17 = vpack.c.bf16 %v516_v15, %v515_v6 }
  0xf5   :  { %v238_v19 = vpop.permute.xlu1 %237  ;;  %657 = vmatmul.bf16.vlgmr.msra.gmra.mxu1 %v541_v17  ;;  %v292_v17 = vadd.f32 %v1582_v42, %v256_v10 }
  0xf6   :  { %v272_v24 = vmul.f32 %v1576_v38, %v238_v19 }
  0xf8   :  { %v308_v26 = vadd.f32 %v1582_v42, %v272_v24  ;;  %v384_v28 = vpop.permute.xlu2 %383 }
  0xf9   :  { %v457_v56 = vmul.f32 %v1589_v44, %v384_v28 }
  0xfe   :  { %v436_v25 = vpop.permute.xlu1 %435 }
  0xff   :  { %v470_v27 = vmul.f32 %v1589_v44, %v436_v25  ;;  %v356_v25 = vpop.permute.xlu0 %355 }
 0x101   :  { %v502_v29 = vadd.f32 %v470_v27, %v308_v26  ;;  %v153_v39 = vpop.permute.xlu2 %152 }
 0x102   :  { %v255_v12 = vmul.f32 %v1576_v38, %v153_v39 }
 0x103   :  { %v534_v31 = vmax.f32 %v502_v29, 0.0  ;;  %v450_v29 = vmul.f32 %v1589_v44, %v356_v25 }
 0x104   :  { %v291_v20 = vadd.f32 %v1582_v42, %v255_v12 }
 0x105   :  { %v550_v32 = vpack.c.bf16 %v534_v31, %v533_v2 }
 0x107   :  { %v173_v35 = vpop.permute.xlu1 %172  ;;  %702 = vmatmul.bf16.gmra.mxu3 %v550_v32 }
 0x108   :  { %v259_v51 = vmul.f32 %v1576_v38, %v173_v35 }
 0x10a   :  { %v295_v60 = vadd.f32 %v1582_v42, %v259_v51  ;;  %v372_v61 = vpop.permute.xlu2 %371 }
 0x10b   :  { %v683_v40 = vpop.f32.mrf.mxu3  ;;  %v454_v13 = vmul.f32 %v1589_v44, %v372_v61 }
 0x10c   :  { %v628_v41 = vpop.f32.mrf.mxu0  ;;  %v1726_v58 = vadd.f32 %v1718_v47, %v683_v40  ;;  %v489_v9 = vadd.f32 %v457_v56, %v295_v60 }
 0x10d   :  { %v1733_v33 = vadd.f32 %v1718_v47, %v628_v41  ;;  %v486_v22 = vadd.f32 %v454_v13, %v292_v17 }
 0x10e   :  { %v521_v15 = vmax.f32 %v489_v9, 0.0 }
 0x10f   :  { %v518_v27 = vmax.f32 %v486_v22, 0.0 }
 0x110   :  { %v348_v48 = vpop.permute.xlu1 %347 }
 0x111   :  { %v448_v30 = vmul.f32 %v1589_v44, %v348_v48 }
 0x113   :  { %v480_v52 = vadd.f32 %v448_v30, %v286_v49  ;;  %v685_v53 = vpop.f32.mrf.mxu3  ;;  %v138_v6 = vpop.permute.xlu2 %137 }
 0x114   :  { %v1729_v54 = vadd.f32 %v1718_v47, %v685_v53  ;;  %v630_v59 = vpop.f32.mrf.mxu0  ;;  %v252_v16 = vmul.f32 %v1576_v38, %v138_v6 }
 0x115   :  { %v512_v63 = vmax.f32 %v480_v52, 0.0  ;;  %v1736_v0 = vadd.f32 %v1718_v47, %v630_v59  ;;  %v261_v52 = vmul.f32 %v1576_v38, %v183_v11 }
 0x116   :  { %v746_v57 = vpack.c.bf16 %v1729_v54, %v1726_v58  ;;  %v288_v28 = vadd.f32 %v1582_v42, %v252_v16  ;;  %v708_v54 = vlaneseq }
 0x117   :  { %v539_v1 = vpack.c.bf16 %v512_v63, %v511_v55  ;;  %v735_v4 = vpack.c.bf16 %v1736_v0, %v1733_v33  ;;  %v297_v56 = vadd.f32 %v1582_v42, %v261_v52  ;;  %v1372_v0 = vmov 0.0|0.0  }
 0x118   :  { %v388_v5 = vpop.permute.xlu1 %387  ;;  %v482_v35 = vadd.f32 %v450_v29, %v288_v28  ;;  %v716_v52 = vshrl.u32 %v708_v54, 7 }
 0x119   :  { %v458_v8 = vmul.f32 %v1589_v44, %v388_v5  ;;  %647 = vmatmul.bf16.gmra.mxu0 %v539_v1 }
 0x11a   :  { %v514_v45 = vmax.f32 %v482_v35, 0.0 }
 0x11b   :  { %v490_v3 = vadd.f32 %v458_v8, %v296_v7  ;;  %v688_v7 = vpop.f32.mrf.mxu3 }
 0x11c   :  { %v352_v2 = vpop.permute.xlu2 %351 }
 0x11d   :  { %v522_v14 = vmax.f32 %v490_v3, 0.0  ;;  %v449_v34 = vmul.f32 %v1589_v44, %v352_v2 }
 0x11f   :  { %v544_v18 = vpack.c.bf16 %v522_v14, %v521_v15 }
 0x120   :  { %v368_v19 = vpop.permute.xlu1 %367 }
 0x121   :  { %v453_v23 = vmul.f32 %v1589_v44, %v368_v19  ;;  %672 = vmatmul.bf16.gmra.mxu2 %v544_v18 }
 0x123   :  { %v485_v24 = vadd.f32 %v453_v23, %v291_v20  ;;  %v690_v8 = vpop.f32.mrf.mxu3 }
 0x124   :  { %v633_v26 = vpop.f32.mrf.mxu0  ;;  %v396_v30 = vpop.permute.xlu2 %395 }
 0x125   :  { %v517_v21 = vmax.f32 %v485_v24, 0.0  ;;  %v1757_v40 = vadd.f32 %v1718_v47, %v633_v26  ;;  %v460_v55 = vmul.f32 %v1589_v44, %v396_v30  ;;  %v691_v24 = vadd.f32 %v1718_v47, %v690_v8  ;;  %v1222_v8 = vld [vmem:[%s1906_s5 + $0x28] sm:$0xff] }
 0x127   :  { %v542_v31 = vpack.c.bf16 %v518_v27, %v517_v21  ;;  %v689_v27 = vadd.f32 %v1718_v47, %v688_v7 }
 0x129   :  { %v133_v32 = vpop.permute.xlu1 %132  ;;  %662 = vmatmul.bf16.gmra.mxu1 %v542_v31  ;;  %v747_v28 = vpack.c.bf16 %v691_v24, %v689_v27  ;;  %v1238_v24 = vld [vmem:[%s1910_s9 + $0x28] sm:$0xff]  ;;  %v1237_v27 = vld [vmem:[%s1910_s9 + $0x20] sm:$0xff] }
 0x12a   :  { %v251_v37 = vmul.f32 %v1576_v38, %v133_v32 }
 0x12c   :  { %v287_v36 = vadd.f32 %v1582_v42, %v251_v37  ;;  %v635_v39 = vpop.f32.mrf.mxu0 }
 0x12d   :  { %v1760_v41 = vadd.f32 %v1718_v47, %v635_v39 }
 0x12e   :  { %v481_v43 = vadd.f32 %v449_v34, %v287_v36 }
 0x12f   :  { %v736_v46 = vpack.c.bf16 %v1760_v41, %v1757_v40  ;;  %v1218_v41 = vld [vmem:[%s1906_s5 + $0x8] sm:$0xff] }
 0x130   :  { %v513_v48 = vmax.f32 %v481_v43, 0.0 }
 0x131   :  { %v188_v49 = vpop.permute.xlu1 %187 }
 0x132   :  { %v540_v50 = vpack.c.bf16 %v514_v45, %v513_v48  ;;  %v262_v51 = vmul.f32 %v1576_v38, %v188_v49 }
 0x134   :  { %652 = vmatmul.bf16.gmra.mxu0 %v540_v50  ;;  %v298_v53 = vadd.f32 %v1582_v42, %v262_v51 }
 0x136   :  { %v492_v59 = vadd.f32 %v460_v55, %v298_v53 }
 0x138   :  { %v524_v63 = vmax.f32 %v492_v59, 0.0 }
 0x13a   :  { %v392_v62 = vpop.permute.xlu1 %391 }
 0x13b   :  { %v459_v60 = vmul.f32 %v1589_v44, %v392_v62  ;;  %v1224_v62 = vld [vmem:[%s1906_s5 + $0x38] sm:$0xff] }
 0x13c   :  { %853 = vmatpush.bf16.msrb.mxu3 %v1224_v62 }
 0x13d   :  { %v491_v61 = vadd.f32 %v459_v60, %v297_v56  ;;  %v1223_v60 = vld [vmem:[%s1906_s5 + $0x30] sm:$0xff] }
 0x13e   :  { %v1770_v11 = vpop.f32.mrf.mxu0 }
 0x13f   :  { %v523_v1 = vmax.f32 %v491_v61, 0.0  ;;  %v709_v61 = vand.u32 127, %v708_v54 }
 0x140   :  { %854 = vmatpush.bf16.msrb.mxu3 %v1223_v60 }
 0x141   :  { %v545_v5 = vpack.c.bf16 %v524_v63, %v523_v1  ;;  %v717_v63 = vmul.u32 8, %v716_v52  ;;  %vm726_vm3 = vcmp.lt.s32.totalorder %v709_v61, 16 }
 0x143   :  { %677 = vmatmul.bf16.gmra.mxu2 %v545_v5 }
 0x144   :  { %855 = vmatpush.bf16.msrb.mxu3 %v1222_v8 }
 0x146   :  { %v640_v12 = vpop.f32.mrf.mxu0 }
 0x147   :  { %v641_v5 = vadd.f32 %v1718_v47, %v640_v12  ;;  %v1220_v12 = vld [vmem:[%s1906_s5 + $0x18] sm:$0xff] }
 0x14d   :  { %v693_v9 = vpop.f32.mrf.mxu3 }
 0x14e   :  { %v694_v16 = vadd.f32 %v1718_v47, %v693_v9  ;;  %v718_v9 = vsub.s32 %v709_v61, %v717_v63 }
 0x150   :  { %vm720_vm0 = vcmp.ge.s32.totalorder %v718_v9, 0  ;;  %vm722_vm1 = vcmp.lt.s32.totalorder %v718_v9, 8 }
 0x151   :  { %vm724_vm2 = vmand %vm720_vm0, %vm722_vm1 }
 0x152   :  { %vm728_vm4 = vmand %vm724_vm2, %vm726_vm3 }
 0x153   :  { %vm1111_vm5 = vmpackc.low %vm728_vm4, %vm728_vm4 }
 0x155   :  { %v695_v10 = vpop.f32.mrf.mxu3 }
 0x156   :  { %v696_v22 = vadd.f32 %v1718_v47, %v695_v10  ;;  %v639_v10 = vadd.f32 %v1718_v47, %v1770_v11 }
 0x158   :  { %v748_v25 = vpack.c.bf16 %v696_v22, %v694_v16  ;;  %v1240_v22 = vld [vmem:[%s1910_s9 + $0x38] sm:$0xff]  ;;  %v1230_v16 = vld [vmem:[%s1908_s7 + $0x28] sm:$0xff] }
 0x15d   :  { %v698_v38 = vpop.f32.mrf.mxu3 }
 0x15e   :  { %v699_v19 = vadd.f32 %v1718_v47, %v698_v38 }
 0x15f   :  { %v1780_v29 = vpop.f32.mrf.mxu2 }
 0x160   :  { %v643_v14 = vpop.f32.mrf.mxu0 }
 0x161   :  { %v644_v1 = vadd.f32 %v1718_v47, %v643_v14 }
 0x165   :  { %v700_v3 = vpop.f32.mrf.mxu3 }
 0x166   :  { %v701_v17 = vadd.f32 %v1718_v47, %v700_v3  ;;  %v737_v3 = vpack.c.bf16 %v641_v5, %v639_v10 }
 0x167   :  { %v1785_v32 = vpop.f32.mrf.mxu2 }
 0x168   :  { %v645_v20 = vpop.f32.mrf.mxu0  ;;  %v749_v23 = vpack.c.bf16 %v701_v17, %v699_v19  ;;  %v669_v19 = vadd.f32 %v1718_v47, %v1780_v29 }
 0x169   :  { %v646_v56 = vadd.f32 %v1718_v47, %v645_v20  ;;  %v1232_v20 = vld [vmem:[%s1908_s7 + $0x38] sm:$0xff] }
 0x16b   :  { %v738_v7 = vpack.c.bf16 %v646_v56, %v644_v1 }
 0x172   :  { %v658_v6 = vpop.f32.mrf.mxu1 }
 0x173   :  { %v659_v45 = vadd.f32 %v1718_v47, %v658_v6 }
 0x17a   :  { %v660_v26 = vpop.f32.mrf.mxu1 }
 0x17b   :  { %v661_v36 = vadd.f32 %v1718_v47, %v660_v26  ;;  %v1229_v26 = vld [vmem:[%s1908_s7 + $0x20] sm:$0xff] }
 0x17d   :  { %v741_v49 = vpack.c.bf16 %v661_v36, %v659_v45  ;;  %v1225_v45 = vld [vmem:[%s1908_s7] sm:$0xff] }
 0x18a   :  { %v703_v13 = vpop.f32.mrf.mxu3 }
 0x18b   :  { %v704_v15 = vadd.f32 %v1718_v47, %v703_v13  ;;  %v1221_v13 = vld [vmem:[%s1906_s5 + $0x20] sm:$0xff] }
 0x18c   :  { %856 = vmatpush.bf16.msrb.mxu3 %v1221_v13 }
 0x190   :  { %857 = vmatpush.bf16.msrb.mxu3 %v1220_v12 }
 0x192   :  { %v705_v42 = vpop.f32.mrf.mxu3 }
 0x193   :  { %v706_v44 = vadd.f32 %v1718_v47, %v705_v42 }
 0x195   :  { %v750_v18 = vpack.c.bf16 %v706_v44, %v704_v15  ;;  %v1219_v15 = vld [vmem:[%s1906_s5 + $0x10] sm:$0xff] }
 0x196   :  { %v648_v21 = vpop.f32.mrf.mxu0  ;;  %858 = vmatpush.bf16.msrb.mxu3 %v1219_v15 }
 0x197   :  { %764 = vmatpush.bf16.msrb.mxu2 %v750_v18  ;;  %v649_v53 = vadd.f32 %v1718_v47, %v648_v21  ;;  %v1371_v18 = vmov 1.0|1.0   ;;  %v1228_v21 = vld [vmem:[%s1908_s7 + $0x18] sm:$0xff] }
 0x19a   :  { %859 = vmatpush.bf16.msrb.mxu3 %v1218_v41 }
 0x19b   :  { %765 = vmatpush.bf16.msrb.mxu2 %v749_v23  ;;  %v1239_v23 = vld [vmem:[%s1910_s9 + $0x30] sm:$0xff] }
 0x19e   :  { %v650_v2 = vpop.f32.mrf.mxu0 }
 0x19f   :  { %766 = vmatpush.bf16.msrb.mxu2 %v748_v25  ;;  %v651_v51 = vadd.f32 %v1718_v47, %v650_v2  ;;  %v1235_v2 = vld [vmem:[%s1910_s9 + $0x10] sm:$0xff] }
 0x1a1   :  { %v739_v59 = vpack.c.bf16 %v651_v51, %v649_v53 }
 0x1a3   :  { %767 = vmatpush.bf16.msrb.mxu2 %v747_v28  ;;  %v1236_v28 = vld [vmem:[%s1910_s9 + $0x18] sm:$0xff] }
 0x1a4   :  { %v673_v48 = vpop.f32.mrf.mxu2 }
 0x1a5   :  { %v674_v40 = vadd.f32 %v1718_v47, %v673_v48  ;;  %v1233_v48 = vld [vmem:[%s1910_s9] sm:$0xff] }
 0x1a6   :  { %v663_v31 = vpop.f32.mrf.mxu1 }
 0x1a7   :  { %768 = vmatpush.bf16.msrb.mxu2 %v746_v57  ;;  %v664_v34 = vadd.f32 %v1718_v47, %v663_v31  ;;  %v1227_v31 = vld [vmem:[%s1908_s7 + $0x10] sm:$0xff] }
 0x1ac   :  { %v675_v55 = vpop.f32.mrf.mxu2 }
 0x1ad   :  { %v676_v44 = vadd.f32 %v1718_v47, %v675_v55  ;;  %v1312_v55 = vld [vmem:[%s1911_s10] ss:$0 sm:$0xff] }
 0x1ae   :  { %v665_v37 = vpop.f32.mrf.mxu1 }
 0x1af   :  { %v666_v35 = vadd.f32 %v1718_v47, %v665_v37  ;;  %v744_v17 = vpack.c.bf16 %v676_v44, %v674_v40 }
 0x1b1   :  { %v653_v39 = vpop.f32.mrf.mxu0  ;;  %v742_v43 = vpack.c.bf16 %v666_v35, %v664_v34 }
 0x1b2   :  { %v654_v57 = vadd.f32 %v1718_v47, %v653_v39  ;;  %v1226_v39 = vld [vmem:[%s1908_s7 + $0x8] sm:$0xff] }
 0x1b3   :  { %751 = vmatpush.bf16.msrb.mxu1 %v742_v43  ;;  %v1234_v43 = vld [vmem:[%s1910_s9 + $0x8] sm:$0xff] }
 0x1b7   :  { %752 = vmatpush.bf16.msrb.mxu1 %v741_v49  ;;  %v1310_v49 = vld [vmem:[%s1907_s6] ss:$0 sm:$0xff] }
 0x1b9   :  { %v655_v58 = vpop.f32.mrf.mxu0 }
 0x1ba   :  { %v656_v50 = vadd.f32 %v1718_v47, %v655_v58 }
 0x1bc   :  { %v740_v30 = vpack.c.bf16 %v656_v50, %v654_v57 }
 0x1be   :  { %753 = vmatpush.bf16.msrb.mxu1 %v740_v30  ;;  %v1311_v30 = vld [vmem:[%s1909_s8] ss:$0 sm:$0xff]  ;;  %s1374_s8 = smov [#allocation5]  }
 0x1bf   :  { %s1063_s10 = sshll.u32 %s1374_s8, 4  ;;  %s1064_s10 = int_to_ptr.vmem [resolvable:$true] %s1063_s10 }
 0x1c2   :  { %754 = vmatpush.bf16.msrb.mxu1 %v739_v59 }
 0x1c6   :  { %v678_v38 = vpop.f32.mrf.mxu2  ;;  %755 = vmatpush.bf16.msrb.mxu1 %v738_v7 }
 0x1c7   :  { %v679_v11 = vadd.f32 %v1718_v47, %v678_v38 }
 0x1ca   :  { %756 = vmatpush.bf16.msrb.mxu1 %v737_v3 }
 0x1ce   :  { %v680_v14 = vpop.f32.mrf.mxu2  ;;  %757 = vmatpush.bf16.msrb.mxu1 %v736_v46  ;;  %v671_v46 = vadd.f32 %v1718_v47, %v1785_v32 }
 0x1cf   :  { %v681_v42 = vadd.f32 %v1718_v47, %v680_v14  ;;  %v1231_v47 = vld [vmem:[%s1908_s7 + $0x30] sm:$0xff]  ;;  %s1373_s7 = smov [#allocation3]  }
 0x1d0   :  { %v743_v33 = vpack.c.bf16 %v671_v46, %v669_v19  ;;  %s1052_s17 = sshll.u32 %s1373_s7, 4  ;;  %s1053_s17 = int_to_ptr.vmem [resolvable:$true] %s1052_s17 }
 0x1d1   :  { %v745_v6 = vpack.c.bf16 %v681_v42, %v679_v11 }
 0x1d2   :  { %758 = vmatpush.bf16.msrb.mxu1 %v735_v4  ;;  %v1217_v4 = vld [vmem:[%s1906_s5] sm:$0xff] }
 0x1d3   :  { %769 = vmatpush.bf16.msrb.mxu2 %v745_v6  ;;  %860 = vmatpush.bf16.msrb.mxu3 %v1217_v4 }
 0x1d5   :  { %1112 = vmatmul.msk.bf16.vlgmr.msrb.gmra.mxu1 %vm1111_vm5, %v1371_v18 }
 0x1d6   :  { %936 = vmatpush.bf16.msra.mxu1 %v1232_v20 }
 0x1d7   :  { %770 = vmatpush.bf16.msrb.mxu2 %v744_v17 }
 0x1da   :  { %937 = vmatpush.bf16.msra.mxu1 %v1231_v47 }
 0x1db   :  { %771 = vmatpush.bf16.msrb.mxu2 %v743_v33 }
 0x1de   :  { %772 = vmatmul.bf16.vlgmr.msrb.gmra.mxu2 %v1372_v0  ;;  %938 = vmatpush.bf16.msra.mxu1 %v1230_v16 }
 0x1df   :  { %1018 = vmatpush.bf16.msra.mxu2 %v1240_v22 }
 0x1e2   :  { %939 = vmatpush.bf16.msra.mxu1 %v1229_v26 }
 0x1e3   :  { %1019 = vmatpush.bf16.msra.mxu2 %v1239_v23 }
 0x1e6   :  { %940 = vmatpush.bf16.msra.mxu1 %v1228_v21 }
 0x1e7   :  { %1020 = vmatpush.bf16.msra.mxu2 %v1238_v24 }
 0x1ea   :  { %941 = vmatpush.bf16.msra.mxu1 %v1227_v31 }
 0x1eb   :  { %1021 = vmatpush.bf16.msra.mxu2 %v1237_v27 }
 0x1ee   :  { %942 = vmatpush.bf16.msra.mxu1 %v1226_v39 }
 0x1ef   :  { %1022 = vmatpush.bf16.msra.mxu2 %v1236_v28 }
 0x1f2   :  { %943 = vmatpush.bf16.msra.mxu1 %v1225_v45 }
 0x1f3   :  { %1023 = vmatpush.bf16.msra.mxu2 %v1235_v2 }
 0x1f7   :  { %1024 = vmatpush.bf16.msra.mxu2 %v1234_v43 }
 0x1fb   :  { %1025 = vmatpush.bf16.msra.mxu2 %v1233_v48 }
 0x252   :  { %v760_v25 = vpop.f32.mrf.mxu1 }
 0x25a   :  { %v762_v29 = vpop.f32.mrf.mxu1 }
 0x261   :  { %v773_v32 = vpop.f32.mrf.mxu2 }
 0x262   :  { %v774_v37 = vadd.f32 %v773_v32, %v760_v25 }
 0x264   :  { %v783_v34 = vmul.f32 0.125, %v774_v37 }
 0x266   :  { %v784_v35 = vpack.c.bf16 %v783_v34, %v783_v34 }
 0x268   :  { %861 = vmatmul.bf16.vlgmr.msrb.gmra.mxu3 %v784_v35 }
 0x269   :  { %v775_v36 = vpop.f32.mrf.mxu2 }
 0x2eb   :  { %v862_v58 = vpop.f32.mrf.mxu3 }
 0x2ec   :  { %v863_v54 = vadd.f32 %v1310_v49, %v862_v58 }
 0x2ee   :  { %v866_v57 = vmax.f32 %v863_v54, 0.0 }
 0x2f0   :  { %v867_v50 = vpack.c.bf16 %v866_v57, %v866_v57 }
 0x2f2   :  { %944 = vmatmul.bf16.vlgmr.msra.gmra.mxu1 %v867_v50  ;;  %1026 = vmatmul.bf16.vlgmr.msra.gmra.mxu2 %v867_v50 }
 0x2f3   :  { %v864_v51 = vpop.f32.mrf.mxu3 }
 0x36f   :  { %v945_v52 = vpop.f32.mrf.mxu1 }
 0x370   :  { %v946_v53 = vadd.f32 %v1311_v30, %v945_v52 }
 0x372   :  { %949 = vst [vmem:[#allocation3] sm:$0xff] %v946_v53 }
 0x373   :  { %1057 = dma.vmem_to_hbm [thread:$0]  %s1053_s17, 128, %s1055_s19, [#allocation4]  }
 0x375   :  { %v1027_v62 = vpop.f32.mrf.mxu2 }
 0x376   :  { %v1028_v56 = vadd.f32 %v1312_v55, %v1027_v62 }
 0x377   :  { %v947_v59 = vpop.f32.mrf.mxu1 }
 0x378   :  { %v1032_v60 = vand.u32 2147483647, %v1028_v56  ;;  %v1031_v12 = vmax.f32 %v1028_v56, 0.0 }
 0x37a   :  { %v1033_v61 = vsub.f32 0.0, %v1032_v60 }
 0x37c   :  { %v1034_v63 = vmul.f32 1.442695, %v1033_v61 }
 0x37d   :  { %v1029_v1 = vpop.f32.mrf.mxu2 }
 0x37e   :  { %1313 = vpow2.f32 %v1034_v63 }
 0x384   :  { %v1314_v5 = vpop.eup %1313 }
 0x385   :  { %v1036_v7 = vadd.f32 1.0, %v1314_v5  ;;  %v1039_v8 = vmul.f32 -0.5, %v1314_v5  ;;  %v1042_v10 = vand.u32 2147483647, %v1314_v5 }
 0x387   :  { %1315 = vlog2.f32 %v1036_v7  ;;  %v1040_v9 = vadd.f32 1.0, %v1039_v8  ;;  %vm1043_vm6 = vcmp.lt.f32.partialorder %v1042_v10, 0.0004427343 }
 0x389   :  { %v1041_v13 = vmul.f32 %v1314_v5, %v1040_v9 }
 0x38d   :  { %v1316_v38 = vpop.eup %1315 }
 0x38e   :  { %v1038_v3 = vmul.f32 0.6931472, %v1316_v38 }
 0x390   :  { %v1044_v14 = vsel %vm1043_vm6, %v1041_v13, %v1038_v3 }
 0x391   :  { %v1045_v11 = vadd.f32 %v1044_v14, %v1031_v12 }
 0x393   :  { %1046 = vst [vmem:[#allocation5] sm:$0xff] %v1045_v11 }
 0x394   :  { %1068 = dma.vmem_to_hbm [thread:$0]  %s1064_s10, 128, %s1066_s20, [#allocation6]  }
 0x395   :  { %1365 = dma.done.wait [#allocation4], 128  }
 0x396   :  { %1366 = vsyncadd [#allocation4], 4294967168 }
 0x397   :  { %1367 = dma.done.wait [#allocation6], 128  }
 0x398   :  { %1368 = vsyncadd [#allocation6], 4294967168 }
 0x399   :  { %1077 = vsyncpa [#allocation4], 1 }
 0x39a   :  { %1078 = vsyncpa [#allocation6], 1 }

</bundles_post_ra>
